<compile_context>
chip_gen: v5e
topology: v5e:2x2
jax: 0.10.0
libtpu: 0.0.40
codegen_flags: <defaults>
</compile_context>

<pallas_src>
import functools

import jax
import jax.numpy as jnp
from jax.experimental import pallas as pl
from jax.experimental.pallas import tpu as pltpu


def _fused_double_conv_kernel(x_ref, w1_ref, b1_ref, w2_ref, b2_ref, o_ref,
                              xpad_ref, hpad_ref, *, H, WCin, WCout):
    """Fused conv3x3+ReLU -> conv3x3+ReLU for one batch element.

    x_ref : (1, H, W*Cin)         row-flattened unpadded input
    w1_ref: (3, W*Cin, W*Cout)    banded conv1 weights (dy, K, N)
    b1_ref: (1, W*Cout)           conv1 bias tiled along W
    w2_ref: (3, W*Cout, W*Cout)   banded conv2 weights
    b2_ref: (1, W*Cout)           conv2 bias tiled along W
    o_ref : (1, H, W*Cout)        lane-dense output
    xpad_ref: VMEM (H+2, W*Cin)   H-padded layer-1 input
    hpad_ref: VMEM (H+2, W*Cout)  H-padded layer-1 activation (never hits HBM)
    """
    # ---- layer 1: conv 3x3 (pad=1) + ReLU, intermediate kept in VMEM ----
    xpad_ref[...] = jnp.zeros_like(xpad_ref)          # zero halo rows (cheap)
    xpad_ref[1:H + 1, :] = x_ref[0].astype(jnp.float32)

    acc = jnp.zeros((H, WCout), jnp.float32)
    for dy in range(3):                               # 3 MXU matmuls, K=W*Cin
        acc += jnp.dot(xpad_ref[dy:dy + H, :], w1_ref[dy],
                       preferred_element_type=jnp.float32)
    acc = jnp.maximum(acc + b1_ref[...], 0.0)         # bias + ReLU on VPU

    # ---- layer 2: conv 3x3 (pad=1) + ReLU ----
    hpad_ref[...] = jnp.zeros_like(hpad_ref)
    hpad_ref[1:H + 1, :] = acc

    acc2 = jnp.zeros((H, WCout), jnp.float32)
    for dy in range(3):                               # 3 MXU matmuls, K=W*Cout
        acc2 += jnp.dot(hpad_ref[dy:dy + H, :], w2_ref[dy],
                        preferred_element_type=jnp.float32)
    acc2 = jnp.maximum(acc2 + b2_ref[...], 0.0)

    o_ref[0] = acc2.astype(o_ref.dtype)               # (H, W*Cout) lane-dense


def _band_weights(w_hwio, W):
    """(3, 3, Cin, Cout) HWIO weights -> (3, W*Cin, W*Cout) banded matrices.

    band[dy, win*Cin+ci, wout*Cout+co] = w[dy, dx, ci, co] with dx = win-wout+1,
    and zero where dx falls outside [0, 3) — this encodes the width-direction
    zero padding, so the kernel only needs an H halo.
    """
    _, _, Cin, Cout = w_hwio.shape
    wi = jnp.arange(W)
    dx = jnp.arange(3)
    # shift[dx, win, wout] = 1 iff win == wout + dx - 1
    shift = (wi[None, :, None] == wi[None, None, :] + dx[:, None, None] - 1)
    shift = shift.astype(w_hwio.dtype)                       # (3, W, W)
    band = jnp.einsum("xab,yxio->yaibo", shift, w_hwio)      # (3, W, Cin, W, Cout)
    return band.reshape(3, W * Cin, W * Cout)


def convolutions_forward(x_nchw, params):
    """Equivalent of Convolutions.forward; accepts/returns NCHW."""
    w1, b1, w2, b2 = params
    B, Cin, H, W = x_nchw.shape
    Cout = w1.shape[-1]
    WCin, WCout = W * Cin, W * Cout

    # NCHW -> NHWC -> row-flattened (B, H, W*Cin); no padded copy in HBM.
    x = jnp.transpose(x_nchw, (0, 2, 3, 1)).reshape(B, H, WCin)
    w1b = _band_weights(w1, W)                     # (3, W*Cin, W*Cout)
    w2b = _band_weights(w2, W)                     # (3, W*Cout, W*Cout)
    b1t = jnp.tile(b1, W).reshape(1, WCout)        # bias tiled along W
    b2t = jnp.tile(b2, W).reshape(1, WCout)

    kernel = functools.partial(
        _fused_double_conv_kernel, H=H, WCin=WCin, WCout=WCout)

    out = pl.pallas_call(
        kernel,
        out_shape=jax.ShapeDtypeStruct((B, H, WCout), x_nchw.dtype),
        grid=(B,),
        in_specs=[
            pl.BlockSpec((1, H, WCin), lambda b: (b, 0, 0)),
            pl.BlockSpec((3, WCin, WCout), lambda b: (0, 0, 0)),
            pl.BlockSpec((1, WCout), lambda b: (0, 0)),
            pl.BlockSpec((3, WCout, WCout), lambda b: (0, 0, 0)),
            pl.BlockSpec((1, WCout), lambda b: (0, 0)),
        ],
        out_specs=pl.BlockSpec((1, H, WCout), lambda b: (b, 0, 0)),
        scratch_shapes=[
            pltpu.VMEM((H + 2, WCin), jnp.float32),    # padded layer-1 input
            pltpu.VMEM((H + 2, WCout), jnp.float32),   # padded layer-1 output
        ],
        compiler_params=pltpu.CompilerParams(
            dimension_semantics=("parallel",),         # batch across TCs
            vmem_limit_bytes=32 * 1024 * 1024,
        ),
    )(x, w1b, b1t, w2b, b2t)

    out = out.reshape(B, H, W, Cout)
    return jnp.transpose(out, (0, 3, 1, 2))            # NHWC -> NCHW


def init_params(key, in_channels, out_channels, dtype=jnp.float32):
    """Deterministic init matching the shapes of the PyTorch module."""
    k1, k2, k3, k4 = jax.random.split(key, 4)
    s1 = 1.0 / jnp.sqrt(in_channels * 9.0)
    s2 = 1.0 / jnp.sqrt(out_channels * 9.0)
    w1 = jax.random.uniform(k1, (3, 3, in_channels, out_channels), dtype, -s1, s1)
    b1 = jax.random.uniform(k2, (out_channels,), dtype, -s1, s1)
    w2 = jax.random.uniform(k3, (3, 3, out_channels, out_channels), dtype, -s2, s2)
    b2 = jax.random.uniform(k4, (out_channels,), dtype, -s2, s2)
    return (w1, b1, w2, b2)


def _reference_forward(x_nchw, params):
    """Pure-JAX reference (lax conv) for a correctness check."""
    w1, b1, w2, b2 = params

    def conv(x, w, b):
        y = jax.lax.conv_general_dilated(
            x, w, window_strides=(1, 1), padding="SAME",
            dimension_numbers=("NCHW", "HWIO", "NCHW"),
        )
        return jax.nn.relu(y + b[None, :, None, None])

    return conv(conv(x_nchw, w1, b1), w2, b2)


if __name__ == "__main__":
    key = jax.random.PRNGKey(0)
    kx, kp = jax.random.split(key)

    B, Cin, Cout, H, W = 2, 4, 8, 16, 16
    x = jax.random.normal(kx, (B, Cin, H, W), jnp.float32)
    params = init_params(kp, Cin, Cout)

    out = convolutions_forward(x, params)
    out = jax.block_until_ready(out)

    ref = _reference_forward(x, params)
    assert out.shape == (B, Cout, H, W)
    assert jnp.allclose(out, ref, atol=1e-4, rtol=1e-4)

    print("KERNEL_OK")
</pallas_src>

<mosaic_0001>
module attributes {stable_mosaic.version = 11 : i64} {
  func.func @_fused_double_conv_kernel(%arg0: i32, %arg1: memref<1x16x64xf32, #tpu.memory_space<vmem>>, %arg2: memref<3x64x128xf32, #tpu.memory_space<vmem>>, %arg3: memref<1x128xf32, #tpu.memory_space<vmem>>, %arg4: memref<3x128x128xf32, #tpu.memory_space<vmem>>, %arg5: memref<1x128xf32, #tpu.memory_space<vmem>>, %arg6: memref<1x16x128xf32, #tpu.memory_space<vmem>>, %arg7: memref<18x64xf32, #tpu.memory_space<vmem>>, %arg8: memref<18x128xf32, #tpu.memory_space<vmem>>) attributes {dimension_semantics = [#tpu.dimension_semantics<parallel>], iteration_bounds = array<i64: 2>, scalar_prefetch = 0 : i64, scratch_operands = 2 : i64, tpu.core_type = #tpu.core_type<tc>, window_params = [{transform_indices = @transform_0, window_bounds = array<i64: 1, 16, 64>}, {pipeline_mode = #tpu.pipeline_mode<synchronous>, transform_indices = @transform_1, window_bounds = array<i64: 3, 64, 128>}, {pipeline_mode = #tpu.pipeline_mode<synchronous>, transform_indices = @transform_2, window_bounds = array<i64: 1, 128>}, {pipeline_mode = #tpu.pipeline_mode<synchronous>, transform_indices = @transform_3, window_bounds = array<i64: 3, 128, 128>}, {pipeline_mode = #tpu.pipeline_mode<synchronous>, transform_indices = @transform_4, window_bounds = array<i64: 1, 128>}, {transform_indices = @transform_5, window_bounds = array<i64: 1, 16, 128>}]} {
    %cst = arith.constant 0.000000e+00 : f32
    %0 = vector.broadcast %cst : f32 to vector<18x64xf32>
    %c0 = arith.constant 0 : index
    %c0_0 = arith.constant 0 : index
    %1 = vector.load %arg7[%c0, %c0_0] : memref<18x64xf32, #tpu.memory_space<vmem>>, vector<18x64xf32>
    tpu.vector_store %arg7[%c0, %c0_0], %0 {strides = array<i32>} : memref<18x64xf32, #tpu.memory_space<vmem>>, vector<18x64xf32>,
    %c0_1 = arith.constant 0 : index
    %c0_2 = arith.constant 0 : index
    %c0_3 = arith.constant 0 : index
    %2 = vector.load %arg1[%c0_1, %c0_2, %c0_3] : memref<1x16x64xf32, #tpu.memory_space<vmem>>, vector<1x16x64xf32>
    %3 = vector.shape_cast %2 : vector<1x16x64xf32> to vector<16x64xf32>
    %c1 = arith.constant 1 : index
    %c0_4 = arith.constant 0 : index
    %4 = vector.load %arg7[%c1, %c0_4] : memref<18x64xf32, #tpu.memory_space<vmem>>, vector<16x64xf32>
    tpu.vector_store %arg7[%c1, %c0_4], %3 {strides = array<i32>} : memref<18x64xf32, #tpu.memory_space<vmem>>, vector<16x64xf32>,
    %cst_5 = arith.constant 0.000000e+00 : f32
    %5 = vector.broadcast %cst_5 : f32 to vector<16x128xf32>
    %c0_6 = arith.constant 0 : index
    %c0_7 = arith.constant 0 : index
    %6 = vector.load %arg7[%c0_6, %c0_7] : memref<18x64xf32, #tpu.memory_space<vmem>>, vector<16x64xf32>
    %c0_8 = arith.constant 0 : index
    %c0_9 = arith.constant 0 : index
    %c0_10 = arith.constant 0 : index
    %7 = vector.load %arg2[%c0_8, %c0_9, %c0_10] : memref<3x64x128xf32, #tpu.memory_space<vmem>>, vector<1x64x128xf32>
    %8 = vector.shape_cast %7 : vector<1x64x128xf32> to vector<64x128xf32>
    %cst_11 = arith.constant dense<0.000000e+00> : vector<16x128xf32>
    %9 = tpu.matmul %6, %8, %cst_11 {dimension_numbers = #tpu.dot_dimension_numbers<[1], [0], [0], [1], [0, 0, 1, 1], [], []>} : vector<16x64xf32>, vector<64x128xf32>, vector<16x128xf32> -> vector<16x128xf32>
    %10 = arith.addf %5, %9 : vector<16x128xf32>
    %c1_12 = arith.constant 1 : index
    %c0_13 = arith.constant 0 : index
    %11 = vector.load %arg7[%c1_12, %c0_13] : memref<18x64xf32, #tpu.memory_space<vmem>>, vector<16x64xf32>
    %c1_14 = arith.constant 1 : index
    %c0_15 = arith.constant 0 : index
    %c0_16 = arith.constant 0 : index
    %12 = vector.load %arg2[%c1_14, %c0_15, %c0_16] : memref<3x64x128xf32, #tpu.memory_space<vmem>>, vector<1x64x128xf32>
    %13 = vector.shape_cast %12 : vector<1x64x128xf32> to vector<64x128xf32>
    %cst_17 = arith.constant dense<0.000000e+00> : vector<16x128xf32>
    %14 = tpu.matmul %11, %13, %cst_17 {dimension_numbers = #tpu.dot_dimension_numbers<[1], [0], [0], [1], [0, 0, 1, 1], [], []>} : vector<16x64xf32>, vector<64x128xf32>, vector<16x128xf32> -> vector<16x128xf32>
    %15 = arith.addf %10, %14 : vector<16x128xf32>
    %c2 = arith.constant 2 : index
    %c0_18 = arith.constant 0 : index
    %16 = vector.load %arg7[%c2, %c0_18] : memref<18x64xf32, #tpu.memory_space<vmem>>, vector<16x64xf32>
    %c2_19 = arith.constant 2 : index
    %c0_20 = arith.constant 0 : index
    %c0_21 = arith.constant 0 : index
    %17 = vector.load %arg2[%c2_19, %c0_20, %c0_21] : memref<3x64x128xf32, #tpu.memory_space<vmem>>, vector<1x64x128xf32>
    %18 = vector.shape_cast %17 : vector<1x64x128xf32> to vector<64x128xf32>
    %cst_22 = arith.constant dense<0.000000e+00> : vector<16x128xf32>
    %19 = tpu.matmul %16, %18, %cst_22 {dimension_numbers = #tpu.dot_dimension_numbers<[1], [0], [0], [1], [0, 0, 1, 1], [], []>} : vector<16x64xf32>, vector<64x128xf32>, vector<16x128xf32> -> vector<16x128xf32>
    %20 = arith.addf %15, %19 : vector<16x128xf32>
    %c0_23 = arith.constant 0 : index
    %c0_24 = arith.constant 0 : index
    %21 = vector.load %arg3[%c0_23, %c0_24] : memref<1x128xf32, #tpu.memory_space<vmem>>, vector<1x128xf32>
    %22 = vector.broadcast %21 : vector<1x128xf32> to vector<16x128xf32>
    %23 = arith.addf %20, %22 : vector<16x128xf32>
    %cst_25 = arith.constant 0.000000e+00 : f32
    %24 = vector.broadcast %cst_25 : f32 to vector<16x128xf32>
    %25 = arith.maximumf %23, %24 : vector<16x128xf32>
    %cst_26 = arith.constant 0.000000e+00 : f32
    %26 = vector.broadcast %cst_26 : f32 to vector<18x128xf32>
    %c0_27 = arith.constant 0 : index
    %c0_28 = arith.constant 0 : index
    %27 = vector.load %arg8[%c0_27, %c0_28] : memref<18x128xf32, #tpu.memory_space<vmem>>, vector<18x128xf32>
    tpu.vector_store %arg8[%c0_27, %c0_28], %26 {strides = array<i32>} : memref<18x128xf32, #tpu.memory_space<vmem>>, vector<18x128xf32>,
    %c1_29 = arith.constant 1 : index
    %c0_30 = arith.constant 0 : index
    %28 = vector.load %arg8[%c1_29, %c0_30] : memref<18x128xf32, #tpu.memory_space<vmem>>, vector<16x128xf32>
    tpu.vector_store %arg8[%c1_29, %c0_30], %25 {strides = array<i32>} : memref<18x128xf32, #tpu.memory_space<vmem>>, vector<16x128xf32>,
    %cst_31 = arith.constant 0.000000e+00 : f32
    %29 = vector.broadcast %cst_31 : f32 to vector<16x128xf32>
    %c0_32 = arith.constant 0 : index
    %c0_33 = arith.constant 0 : index
    %30 = vector.load %arg8[%c0_32, %c0_33] : memref<18x128xf32, #tpu.memory_space<vmem>>, vector<16x128xf32>
    %c0_34 = arith.constant 0 : index
    %c0_35 = arith.constant 0 : index
    %c0_36 = arith.constant 0 : index
    %31 = vector.load %arg4[%c0_34, %c0_35, %c0_36] : memref<3x128x128xf32, #tpu.memory_space<vmem>>, vector<1x128x128xf32>
    %32 = vector.shape_cast %31 : vector<1x128x128xf32> to vector<128x128xf32>
    %cst_37 = arith.constant dense<0.000000e+00> : vector<16x128xf32>
    %33 = tpu.matmul %30, %32, %cst_37 {dimension_numbers = #tpu.dot_dimension_numbers<[1], [0], [0], [1], [0, 0, 1, 1], [], []>} : vector<16x128xf32>, vector<128x128xf32>, vector<16x128xf32> -> vector<16x128xf32>
    %34 = arith.addf %29, %33 : vector<16x128xf32>
    %c1_38 = arith.constant 1 : index
    %c0_39 = arith.constant 0 : index
    %35 = vector.load %arg8[%c1_38, %c0_39] : memref<18x128xf32, #tpu.memory_space<vmem>>, vector<16x128xf32>
    %c1_40 = arith.constant 1 : index
    %c0_41 = arith.constant 0 : index
    %c0_42 = arith.constant 0 : index
    %36 = vector.load %arg4[%c1_40, %c0_41, %c0_42] : memref<3x128x128xf32, #tpu.memory_space<vmem>>, vector<1x128x128xf32>
    %37 = vector.shape_cast %36 : vector<1x128x128xf32> to vector<128x128xf32>
    %cst_43 = arith.constant dense<0.000000e+00> : vector<16x128xf32>
    %38 = tpu.matmul %35, %37, %cst_43 {dimension_numbers = #tpu.dot_dimension_numbers<[1], [0], [0], [1], [0, 0, 1, 1], [], []>} : vector<16x128xf32>, vector<128x128xf32>, vector<16x128xf32> -> vector<16x128xf32>
    %39 = arith.addf %34, %38 : vector<16x128xf32>
    %c2_44 = arith.constant 2 : index
    %c0_45 = arith.constant 0 : index
    %40 = vector.load %arg8[%c2_44, %c0_45] : memref<18x128xf32, #tpu.memory_space<vmem>>, vector<16x128xf32>
    %c2_46 = arith.constant 2 : index
    %c0_47 = arith.constant 0 : index
    %c0_48 = arith.constant 0 : index
    %41 = vector.load %arg4[%c2_46, %c0_47, %c0_48] : memref<3x128x128xf32, #tpu.memory_space<vmem>>, vector<1x128x128xf32>
    %42 = vector.shape_cast %41 : vector<1x128x128xf32> to vector<128x128xf32>
    %cst_49 = arith.constant dense<0.000000e+00> : vector<16x128xf32>
    %43 = tpu.matmul %40, %42, %cst_49 {dimension_numbers = #tpu.dot_dimension_numbers<[1], [0], [0], [1], [0, 0, 1, 1], [], []>} : vector<16x128xf32>, vector<128x128xf32>, vector<16x128xf32> -> vector<16x128xf32>
    %44 = arith.addf %39, %43 : vector<16x128xf32>
    %c0_50 = arith.constant 0 : index
    %c0_51 = arith.constant 0 : index
    %45 = vector.load %arg5[%c0_50, %c0_51] : memref<1x128xf32, #tpu.memory_space<vmem>>, vector<1x128xf32>
    %46 = vector.broadcast %45 : vector<1x128xf32> to vector<16x128xf32>
    %47 = arith.addf %44, %46 : vector<16x128xf32>
    %cst_52 = arith.constant 0.000000e+00 : f32
    %48 = vector.broadcast %cst_52 : f32 to vector<16x128xf32>
    %49 = arith.maximumf %47, %48 : vector<16x128xf32>
    %c0_53 = arith.constant 0 : index
    %c0_54 = arith.constant 0 : index
    %c0_55 = arith.constant 0 : index
    %50 = vector.load %arg6[%c0_53, %c0_54, %c0_55] : memref<1x16x128xf32, #tpu.memory_space<vmem>>, vector<1x16x128xf32>
    %51 = vector.shape_cast %50 : vector<1x16x128xf32> to vector<16x128xf32>
    %52 = vector.shape_cast %49 : vector<16x128xf32> to vector<1x16x128xf32>
    tpu.vector_store %arg6[%c0_53, %c0_54, %c0_55], %52 {strides = array<i32>} : memref<1x16x128xf32, #tpu.memory_space<vmem>>, vector<1x16x128xf32>,
    return
  }
  func.func @transform_0(%arg0: i32) -> (i32, i32, i32) {
    %c0_i32 = arith.constant 0 : i32
    %c0_i32_0 = arith.constant 0 : i32
    %c0_i32_1 = arith.constant 0 : i32
    return %arg0, %c0_i32, %c0_i32_0 : i32, i32, i32
  }
  func.func @transform_1(%arg0: i32) -> (i32, i32, i32) {
    %c0_i32 = arith.constant 0 : i32
    %c0_i32_0 = arith.constant 0 : i32
    %c0_i32_1 = arith.constant 0 : i32
    %c0_i32_2 = arith.constant 0 : i32
    return %c0_i32, %c0_i32_0, %c0_i32_1 : i32, i32, i32
  }
  func.func @transform_2(%arg0: i32) -> (i32, i32) {
    %c0_i32 = arith.constant 0 : i32
    %c0_i32_0 = arith.constant 0 : i32
    %c0_i32_1 = arith.constant 0 : i32
    return %c0_i32, %c0_i32_0 : i32, i32
  }
  func.func @transform_3(%arg0: i32) -> (i32, i32, i32) {
    %c0_i32 = arith.constant 0 : i32
    %c0_i32_0 = arith.constant 0 : i32
    %c0_i32_1 = arith.constant 0 : i32
    %c0_i32_2 = arith.constant 0 : i32
    return %c0_i32, %c0_i32_0, %c0_i32_1 : i32, i32, i32
  }
  func.func @transform_4(%arg0: i32) -> (i32, i32) {
    %c0_i32 = arith.constant 0 : i32
    %c0_i32_0 = arith.constant 0 : i32
    %c0_i32_1 = arith.constant 0 : i32
    return %c0_i32, %c0_i32_0 : i32, i32
  }
  func.func @transform_5(%arg0: i32) -> (i32, i32, i32) {
    %c0_i32 = arith.constant 0 : i32
    %c0_i32_0 = arith.constant 0 : i32
    %c0_i32_1 = arith.constant 0 : i32
    return %arg0, %c0_i32, %c0_i32_0 : i32, i32, i32
  }
}

</mosaic_0001>

<bundles_post_ra>
// kernel: tpu_custom_call.1
= control target key start
LH: loop header
LB: loop body
LE: loop exit
PB: predicated region body
PF: predicated region fallthrough
CT: control target
= control target key end

     0   :  { %10 = vsyncpa [#allocation5], 0  ;;  %s1139_s0 = inlined_call_operand.hbm [shape: f32[2,16,64], index: 0, kind: input, shape index: {}]   ;;  %s1140_s1 = inlined_call_operand.hbm [shape: f32[3,64,128], index: 1, kind: input, shape index: {}]   ;;  %s1141_s2 = inlined_call_operand.vmem [shape: f32[1,128], index: 2, kind: input, shape index: {}]   ;;  %s1142_s3 = inlined_call_operand.hbm [shape: f32[3,128,128], index: 3, kind: input, shape index: {}]   ;;  %s1143_s4 = inlined_call_operand.vmem [shape: f32[1,128], index: 4, kind: input, shape index: {}]   ;;  %s1144_s5 = inlined_call_operand.hbm [shape: f32[2,16,128], index: 5, kind: output, shape index: {}]  }
   0x1   :  { %12 = vsyncpa [#allocation5 + $0x1], 0 }
   0x2   :  { %13 = vsyncpa [#allocation8], 0 }
   0x3   :  { %14 = vsyncpa [#allocation6], 0 }
   0x4   :  { %16 = vsyncpa [#allocation6 + $0x1], 0  ;;  %s965_s18 = smov 0   ;;  %s967_s19 = smov 0  }
   0x5   :  { %s969_s20 = smov 0   ;;  %s971_s21 = smov 0  }
   0x6 LB: > { %s986_s22 = sadd.s32 4294967295, %s926_s21   ;;  %s666_s23 = sadd.s32 4294967294, %s926_s21   ;;  %s926_s21 = sphi %s971_s21, %s1156_s21   ;;  %s922_s20 = sphi %s969_s20, %s1155_s20   ;;  %s918_s19 = sphi %s967_s19, %s1154_s19   ;;  %s914_s18 = sphi %s965_s18, %s1153_s18  }
   0x7   : > { %p42_p0 = scmp.ne.s32.totalorder %s918_s19, %s914_s18  ;;  %p43_p1 = scmp.eq.s32.totalorder %s986_s22, 0 }
   0x8   : > { %p150_p2 = scmp.eq.s32.totalorder %s986_s22, 1  ;;  %p156_p3 = scmp.eq.s32.totalorder %s666_s23, 1 }
   0x9   : > { %p995_p4 = por %p43_p1, %p42_p0  ;;  %p667_p5 = scmp.ge.s32.totalorder %s926_s21, 1 }
   0xa   : > { %p1000_p6 = por %p156_p3, %p42_p0  ;;  %p163_p7 = scmp.lt.s32.totalorder %s926_s21, 3 }
   0xb   : > { %s174_s28 = sshll.u32 %s1140_s1, 4  ;;  %s928_s30 = smov [#allocation7]   ;;  %s175_s28 = int_to_ptr.hbm [resolvable:$true] %s174_s28 }
   0xc   : > { %p1008_p8 = pnand %p667_p5, %p163_p7  ;;  %s176_s6 = sshll.u32 %s928_s30, 4  ;;  %s177_s6 = int_to_ptr.vmem [resolvable:$true] %s176_s6 }
   0xd   : > { %s191_s9 = sshll.u32 %s1142_s3, 4  ;;  %s1145_s10 = smov 128   ;;  %s192_s9 = int_to_ptr.hbm [resolvable:$true] %s191_s9 }
   0xe   : > { %p704_p9 = pneg %p1008_p8  ;;  %s930_s11 = smov 8  }
   0xf   : > { %s931_s12 = smov [#allocation9]   ;;  %s1027_s14 = sadd.s32 1, %s926_s21  }
  0x10   : > { %p705_p10 = pnand %p704_p9, %p43_p1  ;;  %s193_s13 = sshll.u32 %s931_s12, 4  ;;  %s194_s13 = int_to_ptr.vmem [resolvable:$true] %s193_s13 }
  0x11   : > { %s29_s15 = sadd.s32 1, %s922_s20  ;;  %s26_s16 = ssub.s32 %s926_s21, %s1027_s14 }
  0x12   : > { %707 = dma.hbm_to_vmem [thread:$0]  (!%p705_p10), %s175_s28, 3072, %s177_s6, [#allocation8], %s1145_s10, %s1145_s10, %s930_s11  }
  0x13   : > { %710 = dma.hbm_to_vmem [thread:$0]  (!%p705_p10), %s192_s9, 6144, %s194_s13, [#allocation8], %s1145_s10, %s1145_s10, %s930_s11  }
  0x14   : > { %p36_p12 = scmp.ne.s32.totalorder %s922_s20, %s918_s19  ;;  %p27_p13 = scmp.eq.s32.totalorder %s26_s16, 0 }
  0x15   : > { %p37_p0 = scmp.eq.s32.totalorder %s926_s21, 0  ;;  %p721_p5 = scmp.lt.s32.totalorder %s926_s21, 2 }
  0x16   : > { %p1037_p3 = por %p150_p2, %p36_p12  ;;  %s210_s26 = sand.u32 1, %s922_s20  }
  0x17   : > { %s1043_s23 = scalar_select %p27_p13, %s922_s20, %s29_s15  }
  0x18   : > { %p38_p7 = por %p37_p0, %p36_p12  ;;  %s671_s27 = sshll.u32 %s210_s26, 4 }
  0x19   : > { %s690_s28 = sshll.u32 %s926_s21, 4  ;;  %s214_s8 = scalar_lea.vmem [#allocation4], %s671_s27 }
  0x1a   : > { %s219_s7 = scalar_lea.hbm %s1139_s0, %s690_s28  ;;  %s222_s9 = sshll.u32 %s214_s8, 4  ;;  %s223_s9 = int_to_ptr.vmem [resolvable:$true] %s222_s9 }
  0x1b   : > { %s220_s12 = sshll.u32 %s219_s7, 4  ;;  %p1050_p2 = pnand %p721_p5, %p38_p7  ;;  %s221_s12 = int_to_ptr.hbm [resolvable:$true] %s220_s12 }
  0x1c   : > { %s211_s15 = scalar_lea.sflag [#allocation5], %s210_s26  ;;  %s826_s16 = sshra.s32 %s221_s12, 4  ;;  %s827_s16 = int_to_ptr.hbm [resolvable:$true] %s826_s16 }
  0x1d   : > { %s828_s10 = scalar_lea.hbm %s827_s16, 16  ;;  %p830_p10 = pneg %p1050_p2 }
  0x1e   : > { %p829_p9 = scmp.ne.s32.totalorder %s827_s16, %s828_s10  ;;  %s833_s30 = scalar_lea.hbm %s1139_s0, 32 }
  0x1f   : > { %p834_p0 = scmp.lt.s32.totalorder %s827_s16, %s1139_s0  ;;  %p835_p5 = scmp.lt.s32.totalorder %s833_s30, %s828_s10 }
  0x20   : > { %p831_p12 = pnand %p830_p10, %p829_p9 }
  0x21   : > { %p836_p7 = por %p835_p5, %p834_p0 }
  0x22   : > { %p832_p13 = pneg %p831_p12 }
  0x24   : > { %p837_p11 = pnand %p836_p7, %p832_p13 }
  0x26   : > { %840 = shalt.err (!%p837_p11)
}
  0x27   : > { %s1151_s26 = smov 128   ;;  %234 = sbr.rel (%p1008_p8) target bundleno = 378 (0x17a), region = 40 }
  0x28   : > { %714 = dma.hbm_to_vmem [thread:$0]  (!%p1050_p2), %s221_s12, 256, %s223_s9, %s211_s15, %s1151_s26, %s1151_s26, %s930_s11  }
  0x29   : > { %s1070_s8 = sand.u32 (!%p1008_p8), 1, %s918_s19  }
  0x2a   : > { %s675_s10 = sshll.u32 (!%p1008_p8), %s1070_s8, 4  ;;  %s237_s16 = scalar_lea.sflag (!%p1008_p8), [#allocation5], %s1070_s8 }
  0x2b   : > { %s1076_s28 = scalar_lea.vmem (!%p1008_p8), [#allocation4], %s675_s10 }
  0x2c   : > { %901 = dma.done.wait (%p995_p4), %s237_s16, 256  }
  0x2d   : > { %903 = vsyncadd (%p995_p4), %s237_s16, 4294967040 }
  0x2e   : > { %905 = dma.done.wait (%p43_p1), [#allocation8], 9216  }
  0x2f   : > { %907 = vsyncadd (%p43_p1), [#allocation8], 4294958080  ;;  %vm278_vm0 = vcmask 523264   ;;  %v932_v0 = vmov 0.0   ;;  %vm281_vm1 = vcmask 517120   ;;  %v307_v1 = vld [vmem:[#allocation7 + $0x78] sm:$0xff] }
  0x30   : > { %279 = vst.msk [vmem:[#allocation2] sm:$0xff] %vm278_vm0, %v932_v0  ;;  %v306_v2 = vld [vmem:[#allocation7 + $0x70] sm:$0xff]  ;;  %322 = vmatpush.msra.mxu2 %v307_v1  ;;  %v296_v3 = vld [vmem:[#allocation7 + $0x38] sm:$0xff]  ;;  %v305_v4 = vld [vmem:[#allocation7 + $0x68] sm:$0xff]  ;;  %s691_s12 = sshll.u32 %s986_s22, 4  ;;  %s277_s30 = scalar_lea.vmem [#allocation10], %s675_s10 }
  0x31   : > { %280 = vst.msk [vmem:[#allocation2 + $0x8] sm:$0xff] %vm278_vm0, %v932_v0  ;;  %351 = vmatpush.msra.mxu1 %v296_v3  ;;  %v295_v5 = vld [vmem:[#allocation7 + $0x30] sm:$0xff]  ;;  %v294_v6 = vld [vmem:[#allocation7 + $0x28] sm:$0xff]  ;;  %v304_v7 = vld [vmem:[#allocation7 + $0x60] sm:$0xff]  ;;  %s570_s27 = scalar_lea.hbm %s1144_s5, %s691_s12  ;;  %s571_s6 = sshll.u32 %s277_s30, 4  ;;  %s572_s6 = int_to_ptr.vmem [resolvable:$true] %s571_s6 }
  0x32   : > { %416 = vst [vmem:[#allocation3] sm:$0xff] %v932_v0  ;;  %323 = vmatpush.msra.mxu2 %v306_v2  ;;  %v283_v8 = vld [vmem:[%s1076_s28] sm:$0xff]  ;;  %v303_v10 = vld [vmem:[#allocation7 + $0x58] sm:$0xff]  ;;  %v301_v15 = vld [vmem:[#allocation7 + $0x48] sm:$0xff]  ;;  %s573_s7 = sshll.u32 %s570_s27, 4  ;;  %s559_s22 = scalar_lea.sflag [#allocation6], %s1070_s8  ;;  %s574_s7 = int_to_ptr.hbm [resolvable:$true] %s573_s7 }
  0x33   : > { %417 = vst [vmem:[#allocation3 + $0x8] sm:$0xff] %v932_v0  ;;  %352 = vmatpush.msra.mxu1 %v295_v5  ;;  %v293_v9 = vld [vmem:[#allocation7 + $0x20] sm:$0xff]  ;;  %v292_v11 = vld [vmem:[#allocation7 + $0x18] sm:$0xff]  ;;  %v302_v13 = vld [vmem:[#allocation7 + $0x50] sm:$0xff]  ;;  %s870_s26 = sshra.s32 %s574_s7, 4  ;;  %s876_s24 = scalar_lea.hbm %s1144_s5, 32  ;;  %s871_s26 = int_to_ptr.hbm [resolvable:$true] %s870_s26 }
  0x34   : > { %418 = vst [vmem:[#allocation3 + $0x10] sm:$0x3] %v932_v0  ;;  %324 = vmatpush.msra.mxu2 %v305_v4  ;;  %v284_v12 = vld [vmem:[%s1076_s28 + $0x8] sm:$0xff]  ;;  %v291_v14 = vld [vmem:[#allocation7 + $0x10] sm:$0xff]  ;;  %v300_v17 = vld [vmem:[#allocation7 + $0x40] sm:$0xff]  ;;  %s872_s16 = scalar_lea.hbm %s871_s26, 16  ;;  %p877_p11 = scmp.lt.s32.totalorder %s871_s26, %s1144_s5 }
  0x35   : > { %282 = vst.msk [vmem:[#allocation2 + $0x10] sm:$0x3] %vm281_vm1, %v932_v0  ;;  %353 = vmatpush.msra.mxu1 %v294_v6  ;;  %v290_v16 = vld [vmem:[#allocation7 + $0x8] sm:$0xff]  ;;  %v289_v19 = vld [vmem:[#allocation7] sm:$0xff]  ;;  %v376_v20 = vld [vmem:[#allocation7 + $0xb8] sm:$0xff]  ;;  %p873_p1 = scmp.ne.s32.totalorder %s871_s26, %s872_s16  ;;  %p878_p2 = scmp.lt.s32.totalorder %s876_s24, %s872_s16 }
  0x36   : > { %285 = vst.msk [vmem:[#allocation2 + $0x1] sm:$0xff] %vm278_vm0, %v283_v8  ;;  %325 = vmatpush.msra.mxu2 %v304_v7  ;;  %v375_v22 = vld [vmem:[#allocation7 + $0xb0] sm:$0xff]  ;;  %v374_v23 = vld [vmem:[#allocation7 + $0xa8] sm:$0xff]  ;;  %v373_v24 = vld [vmem:[#allocation7 + $0xa0] sm:$0xff] }
  0x37   : > { %354 = vmatpush.msra.mxu1 %v293_v9  ;;  %286 = vst.msk [vmem:[#allocation2 + $0x9] sm:$0xff] %vm278_vm0, %v284_v12  ;;  %v372_v26 = vld [vmem:[#allocation7 + $0x98] sm:$0xff]  ;;  %v371_v28 = vld [vmem:[#allocation7 + $0x90] sm:$0xff]  ;;  %v370_v29 = vld [vmem:[#allocation7 + $0x88] sm:$0xff]  ;;  %p874_p4 = pnand %p873_p1, %p1037_p3  ;;  %p879_p9 = por %p878_p2, %p877_p11 }
  0x38   : > { %326 = vmatpush.msra.mxu2 %v303_v10  ;;  %v369_v30 = vld [vmem:[#allocation7 + $0x80] sm:$0xff]  ;;  %v457_v33 = vld [vmem:[#allocation9 + $0xf8] sm:$0xff]  ;;  %v456_v34 = vld [vmem:[#allocation9 + $0xf0] sm:$0xff] }
  0x39   : > { %355 = vmatpush.msra.mxu1 %v292_v11  ;;  %458 = vmatpush.msra.mxu3 %v457_v33  ;;  %v455_v35 = vld [vmem:[#allocation9 + $0xe8] sm:$0xff]  ;;  %v454_v36 = vld [vmem:[#allocation9 + $0xe0] sm:$0xff]  ;;  %v438_v37 = vld [vmem:[#allocation9 + $0x78] sm:$0xff]  ;;  %p875_p8 = pneg %p874_p4 }
  0x3a   : > { %327 = vmatpush.msra.mxu2 %v302_v13  ;;  %v453_v38 = vld [vmem:[#allocation9 + $0xd8] sm:$0xff]  ;;  %481 = vmatpush.msra.mxu0 %v438_v37  ;;  %v437_v39 = vld [vmem:[#allocation9 + $0x70] sm:$0xff]  ;;  %v436_v40 = vld [vmem:[#allocation9 + $0x68] sm:$0xff] }
  0x3b   : > { %356 = vmatpush.msra.mxu1 %v291_v14  ;;  %459 = vmatpush.msra.mxu3 %v456_v34  ;;  %v452_v41 = vld [vmem:[#allocation9 + $0xd0] sm:$0xff]  ;;  %v435_v42 = vld [vmem:[#allocation9 + $0x60] sm:$0xff]  ;;  %v451_v43 = vld [vmem:[#allocation9 + $0xc8] sm:$0xff]  ;;  %p880_p10 = pnand %p879_p9, %p875_p8 }
  0x3c   : > { %328 = vmatpush.msra.mxu2 %v301_v15  ;;  %482 = vmatpush.msra.mxu0 %v437_v39  ;;  %v450_v44 = vld [vmem:[#allocation9 + $0xc0] sm:$0xff]  ;;  %v434_v45 = vld [vmem:[#allocation9 + $0x58] sm:$0xff]  ;;  %v433_v48 = vld [vmem:[#allocation9 + $0x50] sm:$0xff] }
  0x3d   : > { %v297_v18 = vld [vmem:[#allocation2 + $0x1] sm:$0xff]  ;;  %357 = vmatpush.msra.mxu1 %v290_v16  ;;  %460 = vmatpush.msra.mxu3 %v455_v35  ;;  %v432_v50 = vld [vmem:[#allocation9 + $0x48] sm:$0xff]  ;;  %v431_v52 = vld [vmem:[#allocation9 + $0x40] sm:$0xff] }
  0x3e   : > { %v287_v21 = vld [vmem:[#allocation2] sm:$0xff]  ;;  %329 = vmatpush.msra.mxu2 %v300_v17  ;;  %v298_v25 = vld [vmem:[#allocation2 + $0x9] sm:$0xff]  ;;  %483 = vmatpush.msra.mxu0 %v436_v40  ;;  %v520_v51 = vld [vmem:[#allocation9 + $0x168] sm:$0xff] }
  0x3f   : > { %679 = vmatmul.msk.f32.vlgmr.msra.gmra.mxu2 %vm278_vm0, %v297_v18  ;;  %358 = vmatpush.msra.mxu1 %v289_v19  ;;  %v288_v27 = vld [vmem:[#allocation2 + $0x8] sm:$0xff]  ;;  %v521_v49 = vld [vmem:[#allocation9 + $0x170] sm:$0xff]  ;;  %v519_v53 = vld [vmem:[#allocation9 + $0x160] sm:$0xff] }
  0x40   : > { %391 = vmatpush.msrb.mxu2 %v376_v20  ;;  %681 = vmatmul.msk.f32.vlgmr.msra.gmra.mxu1 %vm278_vm0, %v287_v21  ;;  %v366_v31 = vld [vmem:[#allocation2 + $0x2] sm:$0xff]  ;;  %v367_v32 = vld [vmem:[#allocation2 + $0xa] sm:$0xff]  ;;  %v447_v55 = vld [vmem:[#allocation9 + $0xa8] sm:$0xff] }
  0x41   : > { %461 = vmatpush.msra.mxu3 %v454_v36  ;;  %484 = vmatpush.msra.mxu0 %v435_v42  ;;  %v522_v46 = vld [vmem:[#allocation9 + $0x178] sm:$0xff]  ;;  %v448_v54 = vld [vmem:[#allocation9 + $0xb0] sm:$0xff]  ;;  %v446_v56 = vld [vmem:[#allocation9 + $0xa0] sm:$0xff] }
  0x42   : > { %392 = vmatpush.msrb.mxu2 %v375_v22  ;;  %v449_v47 = vld [vmem:[#allocation9 + $0xb8] sm:$0xff]  ;;  %523 = vmatpush.msrb.mxu1 %v522_v46  ;;  %v429_v60 = vld [vmem:[#allocation9 + $0x30] sm:$0xff]  ;;  %v428_v63 = vld [vmem:[#allocation9 + $0x28] sm:$0xff] }
  0x43   : > { %462 = vmatpush.msra.mxu3 %v453_v38  ;;  %485 = vmatpush.msra.mxu0 %v434_v45  ;;  %v430_v57 = vld [vmem:[#allocation9 + $0x38] sm:$0xff]  ;;  %v517_v61 = vld [vmem:[#allocation9 + $0x150] sm:$0xff]  ;;  %v516_v0 = vld [vmem:[#allocation9 + $0x148] sm:$0xff] }
  0x44   : > { %393 = vmatpush.msrb.mxu2 %v374_v23  ;;  %524 = vmatpush.msrb.mxu1 %v521_v49  ;;  %v518_v58 = vld [vmem:[#allocation9 + $0x158] sm:$0xff]  ;;  %v444_v62 = vld [vmem:[#allocation9 + $0x90] sm:$0xff]  ;;  %v443_v1 = vld [vmem:[#allocation9 + $0x88] sm:$0xff] }
  0x45   : > { %463 = vmatpush.msra.mxu3 %v452_v41  ;;  %486 = vmatpush.msra.mxu0 %v433_v48  ;;  %v445_v59 = vld [vmem:[#allocation9 + $0x98] sm:$0xff]  ;;  %v427_v2 = vld [vmem:[#allocation9 + $0x20] sm:$0xff]  ;;  %v425_v7 = vld [vmem:[#allocation9 + $0x10] sm:$0xff] }
  0x46   : > { %394 = vmatpush.msrb.mxu2 %v373_v24  ;;  %525 = vmatpush.msrb.mxu1 %v520_v51  ;;  %v515_v3 = vld [vmem:[#allocation9 + $0x140] sm:$0xff]  ;;  %v426_v5 = vld [vmem:[#allocation9 + $0x18] sm:$0xff]  ;;  %v513_v8 = vld [vmem:[#allocation9 + $0x130] sm:$0xff] }
  0x47   : > { %680 = vmatmul.msk.f32.gmra.mxu2 %vm278_vm0, %v298_v25  ;;  %464 = vmatpush.msra.mxu3 %v451_v43  ;;  %v442_v4 = vld [vmem:[#allocation9 + $0x80] sm:$0xff]  ;;  %v514_v6 = vld [vmem:[#allocation9 + $0x138] sm:$0xff]  ;;  %v424_v9 = vld [vmem:[#allocation9 + $0x8] sm:$0xff] }
  0x48   : > { %395 = vmatpush.msrb.mxu2 %v372_v26  ;;  %682 = vmatmul.msk.f32.gmra.mxu1 %vm278_vm0, %v288_v27  ;;  %v512_v10 = vld [vmem:[#allocation9 + $0x128] sm:$0xff]  ;;  %v423_v11 = vld [vmem:[#allocation9] sm:$0xff]  ;;  %v510_v13 = vld [vmem:[#allocation9 + $0x118] sm:$0xff] }
  0x49   : > { %465 = vmatpush.msra.mxu3 %v450_v44  ;;  %487 = vmatpush.msra.mxu0 %v432_v50  ;;  %v511_v12 = vld [vmem:[#allocation9 + $0x120] sm:$0xff]  ;;  %v509_v14 = vld [vmem:[#allocation9 + $0x110] sm:$0xff]  ;;  %v508_v16 = vld [vmem:[#allocation9 + $0x108] sm:$0xff] }
  0x4a   : > { %396 = vmatpush.msrb.mxu2 %v371_v28  ;;  %526 = vmatpush.msrb.mxu1 %v519_v53  ;;  %v507_v17 = vld [vmem:[#allocation9 + $0x100] sm:$0xff]  ;;  %v764_v21 = vld [vmem:[%s1141_s2] ss:$0 sm:$0xff] }
  0x4b   : > { %466 = vmatpush.msra.mxu3 %v449_v47  ;;  %488 = vmatpush.msra.mxu0 %v431_v52  ;;  %v765_v39 = vld [vmem:[%s1143_s4] ss:$0 sm:$0xff] }
  0x4c   : > { %397 = vmatpush.msrb.mxu2 %v370_v29  ;;  %527 = vmatpush.msrb.mxu1 %v518_v58 }
  0x4d   : > { %467 = vmatpush.msra.mxu3 %v448_v54  ;;  %489 = vmatpush.msra.mxu0 %v430_v57 }
  0x4e   : > { %398 = vmatpush.msrb.mxu2 %v369_v30  ;;  %528 = vmatpush.msrb.mxu1 %v517_v61 }
  0x4f   : > { %683 = vmatmul.msk.f32.vlgmr.msrb.gmra.mxu2 %vm278_vm0, %v366_v31  ;;  %468 = vmatpush.msra.mxu3 %v447_v55 }
  0x50   : > { %490 = vmatpush.msra.mxu0 %v429_v60  ;;  %529 = vmatpush.msrb.mxu1 %v516_v0 }
  0x51   : > { %469 = vmatpush.msra.mxu3 %v446_v56 }
  0x52   : > { %491 = vmatpush.msra.mxu0 %v428_v63  ;;  %530 = vmatpush.msrb.mxu1 %v515_v3 }
  0x53   : > { %470 = vmatpush.msra.mxu3 %v445_v59 }
  0x54   : > { %492 = vmatpush.msra.mxu0 %v427_v2  ;;  %531 = vmatpush.msrb.mxu1 %v514_v6 }
  0x55   : > { %471 = vmatpush.msra.mxu3 %v444_v62 }
  0x56   : > { %493 = vmatpush.msra.mxu0 %v426_v5  ;;  %532 = vmatpush.msrb.mxu1 %v513_v8 }
  0x57   : > { %684 = vmatmul.msk.f32.gmra.mxu2 %vm278_vm0, %v367_v32  ;;  %472 = vmatpush.msra.mxu3 %v443_v1 }
  0x58   : > { %494 = vmatpush.msra.mxu0 %v425_v7  ;;  %533 = vmatpush.msrb.mxu1 %v512_v10 }
  0x59   : > { %473 = vmatpush.msra.mxu3 %v442_v4 }
  0x5a   : > { %495 = vmatpush.msra.mxu0 %v424_v9  ;;  %534 = vmatpush.msrb.mxu1 %v511_v12 }
  0x5c   : > { %496 = vmatpush.msra.mxu0 %v423_v11  ;;  %535 = vmatpush.msrb.mxu1 %v510_v13 }
  0x5e   : > { %536 = vmatpush.msrb.mxu1 %v509_v14 }
  0x60   : > { %537 = vmatpush.msrb.mxu1 %v508_v16 }
  0x62   : > { %538 = vmatpush.msrb.mxu1 %v507_v17 }
  0xbd   : > { %v360_v19 = vpop.f32.mrf.mxu1 }
  0xc2   : > { %v331_v15 = vpop.f32.mrf.mxu2 }
  0xc3   : > { %v361_v20 = vadd.f32 %v360_v19, %v331_v15 }
  0xc5   : > { %v363_v25 = vpop.f32.mrf.mxu1 }
  0xca   : > { %v334_v18 = vpop.f32.mrf.mxu2 }
  0xcb   : > { %v364_v27 = vadd.f32 %v363_v25, %v334_v18 }
  0xd2   : > { %v400_v22 = vpop.f32.mrf.mxu2 }
  0xd3   : > { %v406_v23 = vadd.f32 %v400_v22, %v361_v20 }
  0xd5   : > { %v412_v24 = vadd.f32 %v764_v21, %v406_v23 }
  0xd7   : > { %v414_v26 = vmax.f32 %v412_v24, 0.0 }
  0xd9   : > { %419 = vst [vmem:[#allocation3 + $0x1] sm:$0xff] %v414_v26  ;;  %474 = vmatmul.f32.vlgmr.msra.gmra.mxu3 %v414_v26 }
  0xda   : > { %v403_v28 = vpop.f32.mrf.mxu2 }
  0xdb   : > { %v407_v29 = vadd.f32 %v403_v28, %v364_v27 }
  0xdd   : > { %v413_v30 = vadd.f32 %v764_v21, %v407_v29 }
  0xdf   : > { %v415_v31 = vmax.f32 %v413_v30, 0.0 }
  0xe0   : > { %v421_v32 = vld [vmem:[#allocation3] sm:$0xff] }
  0xe1   : > { %420 = vst [vmem:[#allocation3 + $0x9] sm:$0xff] %v415_v31  ;;  %497 = vmatmul.f32.vlgmr.msra.gmra.mxu0 %v421_v32  ;;  %477 = vmatmul.f32.gmra.mxu3 %v415_v31 }
  0xe8   : > { %v422_v33 = vld [vmem:[#allocation3 + $0x8] sm:$0xff] }
  0xe9   : > { %v504_v34 = vld [vmem:[#allocation3 + $0x2] sm:$0xff]  ;;  %500 = vmatmul.f32.gmra.mxu0 %v422_v33  ;;  %v505_v35 = vld [vmem:[#allocation3 + $0xa] sm:$0xff] }
  0xea   : > { %539 = vmatmul.f32.vlgmr.msrb.gmra.mxu1 %v504_v34 }
  0xf2   : > { %542 = vmatmul.f32.gmra.mxu1 %v505_v35 }
 0x15c   : > { %v475_v37 = vpop.f32.mrf.mxu3 }
 0x15e   : > { %v498_v36 = vpop.f32.mrf.mxu0 }
 0x15f   : > { %v499_v38 = vadd.f32 %v498_v36, %v475_v37 }
 0x164   : > { %v478_v45 = vpop.f32.mrf.mxu3 }
 0x166   : > { %v501_v43 = vpop.f32.mrf.mxu0 }
 0x167   : > { %v540_v40 = vpop.f32.mrf.mxu1  ;;  %v502_v46 = vadd.f32 %v501_v43, %v478_v45 }
 0x168   : > { %v546_v41 = vadd.f32 %v540_v40, %v499_v38 }
 0x16a   : > { %v552_v42 = vadd.f32 %v765_v39, %v546_v41 }
 0x16c   : > { %v554_v44 = vmax.f32 %v552_v42, 0.0 }
 0x16e   : > { %556 = vst [vmem:[%s277_s30] sm:$0xff] %v554_v44 }
 0x16f   : > { %v543_v47 = vpop.f32.mrf.mxu1 }
 0x170   : > { %v547_v48 = vadd.f32 %v543_v47, %v502_v46 }
 0x172   : > { %v553_v49 = vadd.f32 %v765_v39, %v547_v48 }
 0x174   : > { %v555_v50 = vmax.f32 %v553_v49, 0.0 }
 0x176   : > { %557 = vst [vmem:[%s277_s30 + $0x8] sm:$0xff] %v555_v50 }
 0x177   : > { %883 = shalt.err (!%p880_p10)
}
 0x178   : > { %s933_s8 = smov 128   ;;  %s934_s9 = smov 8  }
 0x179   : > { %702 = dma.vmem_to_hbm [thread:$0]  (%p1037_p3), %s572_s6, 256, %s574_s7, %s559_s22, %s933_s8, %s933_s8, %s934_s9  }
 0x17a PF: > { %s588_s12 = sand.u32 1, %s914_s18   ;;  %p1152_p12 = scmp.ge.s32.totalorder %s926_s21, 2 }
 0x17b   : > { %s589_s13 = scalar_lea.sflag [#allocation6], %s588_s12 }
 0x17c   : > { %p716_p13 = pnand %p1152_p12, %p1000_p6 }
 0x17e   : > { %p717_p0 = pneg %p716_p13 }
 0x180   : > { %909 = dma.done.wait (%p717_p0), %s589_s13, 256  }
 0x181   : > { %911 = vsyncadd (%p717_p0), %s589_s13, 4294967040  ;;  %p19_p5 = scmp.ge.s32.totalorder %s1027_s14, 4   ;;  %s1153_s18 = smov %s918_s19 }
 0x182   : > { %s1154_s19 = smov %s922_s20  ;;  %s1155_s20 = smov %s1043_s23 }
 0x183   : > { %s1156_s21 = smov %s1027_s14  ;;  %21 = sbr.rel (!%p19_p5) target bundleno = 6 (0x6), region = 97 }
 0x188   :  { %595 = vsyncpa [#allocation5], 1 }
 0x189   :  { %597 = vsyncpa [#allocation5 + $0x1], 1 }
 0x18a   :  { %598 = vsyncpa [#allocation8], 1 }
 0x18b   :  { %599 = vsyncpa [#allocation6], 1 }
 0x18c   :  { %601 = vsyncpa [#allocation6 + $0x1], 1 }

</bundles_post_ra>
